<compile_context>
chip_gen: v5e
topology: v5e:2x2
jax: 0.10.0
libtpu: 0.0.40
codegen_flags: <defaults>
</compile_context>

<pallas_src>
import math

import jax
import jax.numpy as jnp
from jax.experimental import pallas as pl
from jax.experimental.pallas import tpu as pltpu

EPS = 1e-12


# ------------------------------------------------------------------ small helpers ---
def _round_up(x, m):
    return ((x + m - 1) // m) * m


def _pad2(a, rows, cols, dtype):
    """Zero-pad a 1-D/2-D array to (rows, cols) in `dtype`."""
    a = jnp.asarray(a)
    if a.ndim == 1:
        a = a.reshape(1, -1)
    if a.shape == (rows, cols) and a.dtype == dtype:
        return a
    out = jnp.zeros((rows, cols), dtype)
    return out.at[: a.shape[0], : a.shape[1]].set(a.astype(dtype))


def _largest_tile(n, target):
    """Largest multiple of 128 that divides n and is <= target (n itself if small)."""
    if n <= target:
        return n
    best = 128
    d = 256
    while d <= target:
        if n % d == 0:
            best = d
        d += 128
    return best


def _choose_tq(s):
    for c in (256, 128, 64, 32, 16, 8):
        if s % c == 0:
            return c
    return s


def _vmem_caps():
    """(per-step working-set budget, vmem_limit_bytes) derived from the chip's VMEM."""
    cap = None
    try:
        info = pltpu.get_tpu_info()
        for name in ("vmem_capacity_bytes", "vmem_size_bytes", "vmem_bytes"):
            v = getattr(info, name, None)
            if v:
                cap = int(v)
                break
    except Exception:
        cap = None
    if cap is None:
        cap = 64 << 20          # conservative: v7x physical VMEM
    return int(cap * 0.70), int(cap * 0.85)


def _layernorm_rows(y, gamma, beta, n_true, needs_mask, inv_n):
    """Division-free LayerNorm over the true feature width (pad columns masked)."""
    if needs_mask:
        col = jax.lax.broadcasted_iota(jnp.int32, y.shape, 1)
        valid = col < n_true
        y = jnp.where(valid, y, 0.0)
    u = jnp.sum(y, axis=-1, keepdims=True) * inv_n
    d = y - u
    if needs_mask:
        d = jnp.where(valid, d, 0.0)
    var = jnp.sum(d * d, axis=-1, keepdims=True) * inv_n
    y = d * jax.lax.rsqrt(var + EPS)
    # gamma/beta are zero-padded, so pad output columns stay exactly zero.
    return gamma.astype(jnp.float32) * y + beta.astype(jnp.float32)


# ------------------------------------------------------ generic K-tiled linear ------
def _make_linear_kernel(n_true, n_pad, apply_relu, has_residual, has_ln):
    inv_n = 1.0 / float(n_true)
    needs_mask = n_pad != n_true

    def kernel(*refs):
        i = 0
        x_ref = refs[i]; i += 1
        w_ref = refs[i]; i += 1
        b_ref = refs[i]; i += 1
        res_ref = None
        if has_residual:
            res_ref = refs[i]; i += 1
        g_ref = bt_ref = None
        if has_ln:
            g_ref = refs[i]; i += 1
            bt_ref = refs[i]; i += 1
        o_ref = refs[i]; i += 1
        acc_ref = refs[i]

        kk = pl.program_id(1)

        @pl.when(kk == 0)
        def _():
            acc_ref[...] = jnp.zeros_like(acc_ref)

        acc_ref[...] += jnp.dot(x_ref[...], w_ref[...],
                                preferred_element_type=jnp.float32)

        @pl.when(kk == pl.num_programs(1) - 1)
        def _():
            y = acc_ref[...] + b_ref[...]
            if apply_relu:
                y = jnp.maximum(y, 0.0)
            # TODO(synk): dropout is identity (eval mode); training would draw a mask
            # via pltpu.prng_seed + pltpu.prng_random_bits here.
            if has_residual:
                y = y + res_ref[...].astype(jnp.float32)
            if has_ln:
                y = _layernorm_rows(y, g_ref[...], bt_ref[...],
                                    n_true, needs_mask, inv_n)
            o_ref[...] = y.astype(o_ref.dtype)

    return kernel


def fused_linear_padded(x_pad, w_pad, b_pad, *, n_true, residual=None, gamma=None,
                        beta=None, apply_relu=False, out_dtype, tm, tk, vmem_limit):
    """y = x @ w + b [+relu] [+residual, LayerNorm].  All operands pre-padded."""
    M_pad, K_pad = x_pad.shape
    N_pad = w_pad.shape[1]
    has_residual = residual is not None
    has_ln = gamma is not None

    args = [x_pad, w_pad, b_pad]
    in_specs = [
        pl.BlockSpec((tm, tk), lambda i, kk: (i, kk)),
        pl.BlockSpec((tk, N_pad), lambda i, kk: (kk, 0)),
        pl.BlockSpec((1, N_pad), lambda i, kk: (0, 0)),
    ]
    if has_residual:
        args.append(residual)
        in_specs.append(pl.BlockSpec((tm, N_pad), lambda i, kk: (i, 0)))
    if has_ln:
        args += [gamma, beta]
        in_specs += [pl.BlockSpec((1, N_pad), lambda i, kk: (0, 0)),
                     pl.BlockSpec((1, N_pad), lambda i, kk: (0, 0))]

    kernel = _make_linear_kernel(n_true, N_pad, apply_relu, has_residual, has_ln)
    return pl.pallas_call(
        kernel,
        out_shape=jax.ShapeDtypeStruct((M_pad, N_pad), out_dtype),
        grid_spec=pltpu.PrefetchScalarGridSpec(
            num_scalar_prefetch=0,
            grid=(M_pad // tm, K_pad // tk),
            in_specs=in_specs,
            out_specs=pl.BlockSpec((tm, N_pad), lambda i, kk: (i, 0)),
            scratch_shapes=[pltpu.VMEM((tm, N_pad), jnp.float32)],
        ),
        compiler_params=pltpu.CompilerParams(
            dimension_semantics=("parallel", "arbitrary"),
            vmem_limit_bytes=vmem_limit,
        ),
    )(*args)


# ---------------------------------------------- fused Intermediate + Output (FFN) ---
def _make_ffn_kernel(h_true, h_pad, compute_dtype):
    inv_n = 1.0 / float(h_true)
    needs_mask = h_pad != h_true

    def kernel(x_ref, wi_ref, bi_ref, wo_ref, bo_ref, g_ref, bt_ref, o_ref, acc_ref):
        j = pl.program_id(1)

        @pl.when(j == 0)
        def _():
            acc_ref[...] = jnp.zeros_like(acc_ref)

        # Intermediate block: relu(x @ Wi[:, j-block] + bi[j-block]) -- stays in VMEM.
        h1 = jnp.dot(x_ref[...], wi_ref[...], preferred_element_type=jnp.float32)
        h1 = jnp.maximum(h1 + bi_ref[...], 0.0)
        acc_ref[...] += jnp.dot(h1.astype(compute_dtype), wo_ref[...],
                                preferred_element_type=jnp.float32)

        @pl.when(j == pl.num_programs(1) - 1)
        def _():
            # Output epilogue: bias + residual (the FFN input itself) + LayerNorm.
            y = acc_ref[...] + bo_ref[...] + x_ref[...].astype(jnp.float32)
            y = _layernorm_rows(y, g_ref[...], bt_ref[...], h_true, needs_mask, inv_n)
            o_ref[...] = y.astype(o_ref.dtype)

    return kernel


def fused_ffn(x_pad, wi_pad, bi_pad, wo_pad, bo_pad, gamma, beta, *, h_true,
              out_dtype, compute_dtype, tm, ti, vmem_limit):
    M_pad, H_pad = x_pad.shape
    I_pad = wi_pad.shape[1]
    return pl.pallas_call(
        _make_ffn_kernel(h_true, H_pad, compute_dtype),
        out_shape=jax.ShapeDtypeStruct((M_pad, H_pad), out_dtype),
        grid_spec=pltpu.PrefetchScalarGridSpec(
            num_scalar_prefetch=0,
            grid=(M_pad // tm, I_pad // ti),
            in_specs=[
                pl.BlockSpec((tm, H_pad), lambda i, j: (i, 0)),
                pl.BlockSpec((H_pad, ti), lambda i, j: (0, j)),
                pl.BlockSpec((1, ti), lambda i, j: (0, j)),
                pl.BlockSpec((ti, H_pad), lambda i, j: (j, 0)),
                pl.BlockSpec((1, H_pad), lambda i, j: (0, 0)),
                pl.BlockSpec((1, H_pad), lambda i, j: (0, 0)),
                pl.BlockSpec((1, H_pad), lambda i, j: (0, 0)),
            ],
            out_specs=pl.BlockSpec((tm, H_pad), lambda i, j: (i, 0)),
            scratch_shapes=[pltpu.VMEM((tm, H_pad), jnp.float32)],
        ),
        compiler_params=pltpu.CompilerParams(
            dimension_semantics=("parallel", "arbitrary"),
            vmem_limit_bytes=vmem_limit,
        ),
    )(x_pad, wi_pad, bi_pad, wo_pad, bo_pad, gamma, beta)


# --------------------------------------------------------------- attention core -----
def _make_attn_kernel(nh, dh, h_pad):
    n_cols = nh * dh

    def kernel(q_ref, k_ref, v_ref, m_ref, o_ref):
        q = q_ref[...]                           # (tq, h_pad)  (scale folded into Wq)
        k = k_ref[...]                           # (S,  h_pad)
        v = v_ref[...]
        m = m_ref[...].astype(jnp.float32)       # (1, S) additive mask
        if h_pad > n_cols:
            o_ref[...] = jnp.zeros_like(o_ref)   # zero the pad columns once
        for h in range(nh):
            sl = slice(h * dh, (h + 1) * dh)
            s = jax.lax.dot_general(q[:, sl], k[:, sl], (((1,), (1,)), ((), ())),
                                    preferred_element_type=jnp.float32)  # (tq, S)
            s = s + m
            s = s - jnp.max(s, axis=-1, keepdims=True)
            p = jnp.exp(s)
            inv = pl.reciprocal(jnp.sum(p, axis=-1, keepdims=True), approx=False)
            p = p * inv
            # TODO(synk): attention-probs dropout is identity in eval mode.
            ctx_h = jnp.dot(p.astype(v.dtype), v[:, sl],
                            preferred_element_type=jnp.float32)          # (tq, dh)
            o_ref[:, sl] = ctx_h.astype(o_ref.dtype)

    return kernel


def attention_core(qkv_pad, mask, *, B, S, nh, dh, h_pad, m_pad, out_dtype, tq,
                   vmem_limit):
    """Reads the flat (M_pad, 3*h_pad) QKV buffer, writes flat (M_pad, h_pad) context."""
    nq = S // tq
    return pl.pallas_call(
        _make_attn_kernel(nh, dh, h_pad),
        out_shape=jax.ShapeDtypeStruct((m_pad, h_pad), out_dtype),
        grid_spec=pltpu.PrefetchScalarGridSpec(
            num_scalar_prefetch=0,
            grid=(B, nq),
            in_specs=[
                # q: query-row tile inside batch b; k/v: full sequence of batch b,
                # selected by 128-aligned column-block index (1 = K seg, 2 = V seg).
                pl.BlockSpec((tq, h_pad), lambda b, qi: (b * nq + qi, 0)),
                pl.BlockSpec((S, h_pad), lambda b, qi: (b, 1)),
                pl.BlockSpec((S, h_pad), lambda b, qi: (b, 2)),
                pl.BlockSpec((None, 1, S), lambda b, qi: (b, 0, 0)),
            ],
            out_specs=pl.BlockSpec((tq, h_pad), lambda b, qi: (b * nq + qi, 0)),
        ),
        compiler_params=pltpu.CompilerParams(
            dimension_semantics=("parallel", "parallel"),
            vmem_limit_bytes=vmem_limit,
        ),
    )(qkv_pad, qkv_pad, qkv_pad, mask)


# ---------------------------------------------------------------- parameter prep ----
def prepare_params(params, *, use_bf16_matmul=False):
    """One-time: fold 1/sqrt(dh) into Wq/bq, concat QKV, pad everything lane-dense."""
    nh = params["num_heads"]
    H = params["wq"].shape[0]
    I = params["wi"].shape[1]
    dh = H // nh
    h_pad = _round_up(H, 128)
    i_pad = _round_up(I, 128)
    cdtype = jnp.bfloat16 if use_bf16_matmul else jnp.float32
    inv_sqrt_dh = 1.0 / math.sqrt(dh)

    def padw(w, r, c):
        return _pad2(w, r, c, cdtype)

    def padb(b, c):
        return _pad2(b, 1, c, jnp.float32)

    wq = params["wq"] * inv_sqrt_dh
    bq = params["bq"] * inv_sqrt_dh
    wqkv = jnp.concatenate([padw(wq, h_pad, h_pad),
                            padw(params["wk"], h_pad, h_pad),
                            padw(params["wv"], h_pad, h_pad)], axis=1)
    bqkv = jnp.concatenate([padb(bq, h_pad),
                            padb(params["bk"], h_pad),
                            padb(params["bv"], h_pad)], axis=1)
    return {
        "nh": nh, "dh": dh, "H": H, "I": I, "h_pad": h_pad, "i_pad": i_pad,
        "cdtype": cdtype,
        "wqkv": wqkv, "bqkv": bqkv,
        "wo_attn": padw(params["wo_attn"], h_pad, h_pad),
        "bo_attn": padb(params["bo_attn"], h_pad),
        "g1": padb(params["g1"], h_pad), "b1": padb(params["b1"], h_pad),
        "wi": padw(params["wi"], h_pad, i_pad), "bi": padb(params["bi"], i_pad),
        "wo": padw(params["wo"], i_pad, h_pad), "bo": padb(params["bo"], h_pad),
        "g2": padb(params["g2"], h_pad), "b2": padb(params["b2"], h_pad),
    }


# -------------------------------------------------------------- full encoder layer --
def mol_trans_encoder_forward(prep, hidden_states, attention_mask, *, tm_target=512):
    B, S, H = hidden_states.shape
    assert H == prep["H"]
    # TODO(synk): sequences whose length is not a multiple of 8 need a padded +
    # key-masked attention path; BERT-style inputs are normally already padded.
    assert S % 8 == 0, "sequence length must be a multiple of 8"

    nh, dh = prep["nh"], prep["dh"]
    h_pad, i_pad = prep["h_pad"], prep["i_pad"]
    cdtype = prep["cdtype"]
    out_dtype = hidden_states.dtype

    budget, limit = _vmem_caps()
    bpe = 2 if cdtype == jnp.bfloat16 else 4

    M = B * S
    tm = max(8, min(_round_up(tm_target, 8), _round_up(M, 8)))
    tk = _largest_tile(h_pad, 512)
    ti = _largest_tile(i_pad, 512)

    def worst_step_bytes(tm_b):
        lin_qkv = (2 * tm_b * tk * bpe + 2 * tk * 3 * h_pad * bpe
                   + 2 * tm_b * 3 * h_pad * bpe + tm_b * 3 * h_pad * 4
                   + 8 * 3 * h_pad * 4)
        lin_att = (2 * tm_b * tk * bpe + 2 * tk * h_pad * bpe + 2 * tm_b * h_pad * bpe
                   + 2 * tm_b * h_pad * 4 + tm_b * h_pad * 4 + 24 * h_pad * 4)
        ffn = (2 * tm_b * h_pad * bpe + 2 * h_pad * ti * bpe + 2 * ti * h_pad * bpe
               + 2 * tm_b * h_pad * 4 + tm_b * h_pad * 4 + 24 * h_pad * 4 + 8 * ti * 4)
        return max(lin_qkv, lin_att, ffn)

    while tm > 8 and worst_step_bytes(tm) > budget:
        tm = max(8, _round_up(tm // 2, 8))
    M_pad = _round_up(M, tm)

    # ---- pad activations once; everything below stays in the padded layout --------
    x_pad = jnp.zeros((M_pad, h_pad), cdtype).at[:M, :H].set(
        hidden_states.reshape(M, H).astype(cdtype))

    mask = attention_mask.reshape(B, -1)
    assert mask.shape[1] == S, "only per-key additive masks (B,1,1,S) are supported"
    mask = mask.reshape(B, 1, S).astype(jnp.float32)

    # --- SelfAttention: fused QKV projection (single matmul, lane-dense segments) ---
    qkv = fused_linear_padded(x_pad, prep["wqkv"], prep["bqkv"], n_true=3 * H,
                              out_dtype=cdtype, tm=tm, tk=tk, vmem_limit=limit)

    # --- attention core: no head split/merge transposes through HBM ----------------
    tq = _choose_tq(S)
    ctx = attention_core(qkv, mask, B=B, S=S, nh=nh, dh=dh, h_pad=h_pad,
                         m_pad=M_pad, out_dtype=cdtype, tq=tq, vmem_limit=limit)

    # --- SelfOutput: dense + residual + LayerNorm -----------------------------------
    attn_out = fused_linear_padded(ctx, prep["wo_attn"], prep["bo_attn"], n_true=H,
                                   residual=x_pad, gamma=prep["g1"], beta=prep["b1"],
                                   out_dtype=cdtype, tm=tm, tk=tk, vmem_limit=limit)

    # --- Intermediate + Output fused (M x 4H intermediate never hits HBM) -----------
    out = fused_ffn(attn_out, prep["wi"], prep["bi"], prep["wo"], prep["bo"],
                    prep["g2"], prep["b2"], h_true=H, out_dtype=out_dtype,
                    compute_dtype=cdtype, tm=tm, ti=ti, vmem_limit=limit)

    return out[:M, :H].reshape(B, S, H)


# ---------------------------------------------------------------- pure-JAX reference -
def reference(params, hidden_states, attention_mask):
    B, S, H = hidden_states.shape
    nh = params["num_heads"]
    dh = H // nh

    def linear(x, w, b):
        return x @ w + b

    def layernorm(x, g, bta):
        u = jnp.mean(x, axis=-1, keepdims=True)
        s = jnp.mean((x - u) ** 2, axis=-1, keepdims=True)
        return g * ((x - u) / jnp.sqrt(s + EPS)) + bta

    q = linear(hidden_states, params["wq"], params["bq"])
    k = linear(hidden_states, params["wk"], params["bk"])
    v = linear(hidden_states, params["wv"], params["bv"])

    def heads(t):
        return t.reshape(B, S, nh, dh).transpose(0, 2, 1, 3)

    qh, kh, vh = heads(q), heads(k), heads(v)
    scores = jnp.einsum("bhqd,bhkd->bhqk", qh, kh) / math.sqrt(dh)
    scores = scores + attention_mask
    probs = jax.nn.softmax(scores, axis=-1)
    ctx = jnp.einsum("bhqk,bhkd->bhqd", probs, vh)
    ctx = ctx.transpose(0, 2, 1, 3).reshape(B, S, H)

    attn_out = layernorm(
        linear(ctx, params["wo_attn"], params["bo_attn"]) + hidden_states,
        params["g1"], params["b1"])
    inter = jax.nn.relu(linear(attn_out, params["wi"], params["bi"]))
    out = layernorm(
        linear(inter, params["wo"], params["bo"]) + attn_out,
        params["g2"], params["b2"])
    return out


if __name__ == "__main__":
    # Small shapes consistent with the module: batch=2, seq=8, hidden=32,
    # intermediate=64, heads=4 (head_dim=8).
    B, S, HID, INTER, NH = 2, 8, 32, 64, 4

    key = jax.random.PRNGKey(0)
    ks = jax.random.split(key, 18)

    def w_init(k, shape):
        return jax.random.normal(k, shape, dtype=jnp.float32) * 0.02

    params = {
        "num_heads": NH,
        "wq": w_init(ks[0], (HID, HID)), "bq": w_init(ks[1], (HID,)),
        "wk": w_init(ks[2], (HID, HID)), "bk": w_init(ks[3], (HID,)),
        "wv": w_init(ks[4], (HID, HID)), "bv": w_init(ks[5], (HID,)),
        "wo_attn": w_init(ks[6], (HID, HID)), "bo_attn": w_init(ks[7], (HID,)),
        "g1": 1.0 + 0.1 * jax.random.normal(ks[8], (HID,), dtype=jnp.float32),
        "b1": w_init(ks[9], (HID,)),
        "wi": w_init(ks[10], (HID, INTER)), "bi": w_init(ks[11], (INTER,)),
        "wo": w_init(ks[12], (INTER, HID)), "bo": w_init(ks[13], (HID,)),
        "g2": 1.0 + 0.1 * jax.random.normal(ks[14], (HID,), dtype=jnp.float32),
        "b2": w_init(ks[15], (HID,)),
    }

    hidden_states = jax.random.normal(ks[16], (B, S, HID), dtype=jnp.float32)
    # BERT-style additive mask: last two tokens of batch 1 are padding.
    valid = jnp.ones((B, S), dtype=jnp.float32).at[1, S - 2:].set(0.0)
    attention_mask = (1.0 - valid)[:, None, None, :] * -10000.0

    ref = reference(params, hidden_states, attention_mask)

    # f32 MXU path: tight numerical check against the f32 reference.
    prep = prepare_params(params, use_bf16_matmul=False)
    out = mol_trans_encoder_forward(prep, hidden_states, attention_mask)
    out = jax.block_until_ready(out)
    err = jnp.max(jnp.abs(out - ref))
    assert jnp.allclose(out, ref, atol=2e-4, rtol=2e-4), f"f32 max abs err {err}"

    # bf16 MXU path (production setting on v5e/v6e/v7x): loose sanity check.
    prep_bf16 = prepare_params(params, use_bf16_matmul=True)
    out_bf16 = mol_trans_encoder_forward(prep_bf16, hidden_states, attention_mask)
    out_bf16 = jax.block_until_ready(out_bf16)
    err_bf16 = jnp.max(jnp.abs(out_bf16 - ref))
    assert bool(jnp.isfinite(err_bf16)) and err_bf16 < 0.1, \
        f"bf16 max abs err {err_bf16}"

    print("KERNEL_OK")
</pallas_src>

<mosaic_0001>
module attributes {stable_mosaic.version = 11 : i64} {
  func.func @kernel(%arg0: i32, %arg1: i32, %arg2: memref<16x128xf32, #tpu.memory_space<vmem>>, %arg3: memref<128x384xf32, #tpu.memory_space<vmem>>, %arg4: memref<1x384xf32, #tpu.memory_space<vmem>>, %arg5: memref<16x384xf32, #tpu.memory_space<vmem>>, %arg6: memref<16x384xf32, #tpu.memory_space<vmem>>) attributes {dimension_semantics = [#tpu.dimension_semantics<parallel>, #tpu.dimension_semantics<arbitrary>], iteration_bounds = array<i64: 1, 1>, scalar_prefetch = 0 : i64, scratch_operands = 1 : i64, tpu.core_type = #tpu.core_type<tc>, window_params = [{transform_indices = @transform_0, window_bounds = array<i64: 16, 128>}, {transform_indices = @transform_1, window_bounds = array<i64: 128, 384>}, {pipeline_mode = #tpu.pipeline_mode<synchronous>, transform_indices = @transform_2, window_bounds = array<i64: 1, 384>}, {transform_indices = @transform_3, window_bounds = array<i64: 16, 384>}]} {
    %c0_i32 = arith.constant 0 : i32
    %0 = arith.cmpi eq, %arg1, %c0_i32 : i32
    %1 = arith.extui %0 : i1 to i32
    %c0_i32_0 = arith.constant 0 : i32
    %2 = arith.cmpi ne, %1, %c0_i32_0 : i32
    scf.if %2 {
      %cst_10 = arith.constant 0.000000e+00 : f32
      %12 = vector.broadcast %cst_10 : f32 to vector<16x384xf32>
      %c0_11 = arith.constant 0 : index
      %c0_12 = arith.constant 0 : index
      %13 = vector.load %arg6[%c0_11, %c0_12] : memref<16x384xf32, #tpu.memory_space<vmem>>, vector<16x384xf32>
      tpu.vector_store %arg6[%c0_11, %c0_12], %12 {strides = array<i32>} : memref<16x384xf32, #tpu.memory_space<vmem>>, vector<16x384xf32>,
    } else {
    }
    %c0 = arith.constant 0 : index
    %c0_1 = arith.constant 0 : index
    %3 = vector.load %arg6[%c0, %c0_1] : memref<16x384xf32, #tpu.memory_space<vmem>>, vector<16x384xf32>
    %c0_2 = arith.constant 0 : index
    %c0_3 = arith.constant 0 : index
    %4 = vector.load %arg2[%c0_2, %c0_3] : memref<16x128xf32, #tpu.memory_space<vmem>>, vector<16x128xf32>
    %c0_4 = arith.constant 0 : index
    %c0_5 = arith.constant 0 : index
    %5 = vector.load %arg3[%c0_4, %c0_5] : memref<128x384xf32, #tpu.memory_space<vmem>>, vector<128x384xf32>
    %cst = arith.constant dense<0.000000e+00> : vector<16x384xf32>
    %6 = tpu.matmul %4, %5, %cst {dimension_numbers = #tpu.dot_dimension_numbers<[1], [0], [0], [1], [0, 0, 1, 1], [], []>} : vector<16x128xf32>, vector<128x384xf32>, vector<16x384xf32> -> vector<16x384xf32>
    %7 = arith.addf %3, %6 : vector<16x384xf32>
    %c0_6 = arith.constant 0 : index
    %c0_7 = arith.constant 0 : index
    %8 = vector.load %arg6[%c0_6, %c0_7] : memref<16x384xf32, #tpu.memory_space<vmem>>, vector<16x384xf32>
    tpu.vector_store %arg6[%c0_6, %c0_7], %7 {strides = array<i32>} : memref<16x384xf32, #tpu.memory_space<vmem>>, vector<16x384xf32>,
    %c0_i32_8 = arith.constant 0 : i32
    %9 = arith.cmpi eq, %arg1, %c0_i32_8 : i32
    %10 = arith.extui %9 : i1 to i32
    %c0_i32_9 = arith.constant 0 : i32
    %11 = arith.cmpi ne, %10, %c0_i32_9 : i32
    scf.if %11 {
      %c0_10 = arith.constant 0 : index
      %c0_11 = arith.constant 0 : index
      %12 = vector.load %arg6[%c0_10, %c0_11] : memref<16x384xf32, #tpu.memory_space<vmem>>, vector<16x384xf32>
      %c0_12 = arith.constant 0 : index
      %c0_13 = arith.constant 0 : index
      %13 = vector.load %arg4[%c0_12, %c0_13] : memref<1x384xf32, #tpu.memory_space<vmem>>, vector<1x384xf32>
      %14 = vector.broadcast %13 : vector<1x384xf32> to vector<16x384xf32>
      %15 = arith.addf %12, %14 : vector<16x384xf32>
      %c0_14 = arith.constant 0 : index
      %c0_15 = arith.constant 0 : index
      %16 = vector.load %arg5[%c0_14, %c0_15] : memref<16x384xf32, #tpu.memory_space<vmem>>, vector<16x384xf32>
      tpu.vector_store %arg5[%c0_14, %c0_15], %15 {strides = array<i32>} : memref<16x384xf32, #tpu.memory_space<vmem>>, vector<16x384xf32>,
    } else {
    }
    return
  }
  func.func @transform_0(%arg0: i32, %arg1: i32) -> (i32, i32) {
    %c0_i32 = arith.constant 0 : i32
    return %arg0, %arg1 : i32, i32
  }
  func.func @transform_1(%arg0: i32, %arg1: i32) -> (i32, i32) {
    %c0_i32 = arith.constant 0 : i32
    %c0_i32_0 = arith.constant 0 : i32
    return %arg1, %c0_i32 : i32, i32
  }
  func.func @transform_2(%arg0: i32, %arg1: i32) -> (i32, i32) {
    %c0_i32 = arith.constant 0 : i32
    %c0_i32_0 = arith.constant 0 : i32
    %c0_i32_1 = arith.constant 0 : i32
    return %c0_i32, %c0_i32_0 : i32, i32
  }
  func.func @transform_3(%arg0: i32, %arg1: i32) -> (i32, i32) {
    %c0_i32 = arith.constant 0 : i32
    %c0_i32_0 = arith.constant 0 : i32
    return %arg0, %c0_i32 : i32, i32
  }
}

</mosaic_0001>

<bundles_post_ra>
// kernel: tpu_custom_call.1
= control target key start
LH: loop header
LB: loop body
LE: loop exit
PB: predicated region body
PF: predicated region fallthrough
CT: control target
= control target key end

     0   :  { %8 = vsyncpa [#allocation4], 0  ;;  %s428_s0 = inlined_call_operand.hbm [shape: f32[16,128], index: 0, kind: input, shape index: {}]   ;;  %s429_s1 = inlined_call_operand.hbm [shape: f32[128,384], index: 1, kind: input, shape index: {}]   ;;  %s430_s2 = inlined_call_operand.hbm [shape: f32[1,384], index: 2, kind: input, shape index: {}]   ;;  %s431_s3 = inlined_call_operand.hbm [shape: f32[16,384], index: 3, kind: output, shape index: {}]  }
   0x1   :  { %9 = vsyncpa [#allocation7], 0  ;;  %s28_s14 = sshll.u32 %s429_s1, 4  ;;  %s29_s14 = int_to_ptr.hbm [resolvable:$true] %s28_s14 }
   0x2   :  { %10 = vsyncpa [#allocation5], 0  ;;  %s382_s15 = smov [#allocation6]   ;;  %s15_s19 = sshll.u32 %s428_s0, 4  ;;  %s16_s19 = int_to_ptr.hbm [resolvable:$true] %s15_s19 }
   0x3   :  { %s30_s16 = sshll.u32 %s382_s15, 4  ;;  %s383_s20 = smov 384   ;;  %s31_s16 = int_to_ptr.vmem [resolvable:$true] %s30_s16 }
   0x4   :  { %s384_s21 = smov 24   ;;  %s385_s22 = smov [#allocation3]  }
   0x5   :  { %36 = dma.hbm_to_vmem [thread:$0]  %s29_s14, 6144, %s31_s16, [#allocation7], %s383_s20, %s383_s20, %s384_s21  }
   0x6   :  { %s17_s23 = sshll.u32 %s385_s22, 4  ;;  %s386_s1 = smov 128   ;;  %s18_s23 = int_to_ptr.vmem [resolvable:$true] %s17_s23 }
   0x7   :  { %s387_s24 = smov 8   ;;  %s42_s27 = sshll.u32 %s430_s2, 4  ;;  %s43_s27 = int_to_ptr.hbm [resolvable:$true] %s42_s27 }
   0x8   :  { %23 = dma.hbm_to_vmem [thread:$0]  %s16_s19, 256, %s18_s23, [#allocation4], %s386_s1, %s386_s1, %s387_s24  }
   0x9   :  { %s388_s28 = smov [#allocation8]  }
   0xa   :  { %s44_s0 = sshll.u32 %s388_s28, 4  ;;  %s45_s0 = int_to_ptr.vmem [resolvable:$true] %s44_s0 }
   0xb   :  { %47 = dma.hbm_to_vmem [thread:$0]  %s43_s27, 48, %s45_s0, [#allocation7]  }
   0xc   :  { %376 = dma.done.wait [#allocation4], 256  }
   0xd   :  { %377 = vsyncadd [#allocation4], 4294967040 }
   0xe   :  { %378 = dma.done.wait [#allocation7], 6192  }
   0xf   :  { %379 = vsyncadd [#allocation7], 4294961104  ;;  %v125_v0 = vld [vmem:[#allocation6 + $0x178] sm:$0xff]  ;;  %v122_v1 = vld [vmem:[#allocation6 + $0x160] sm:$0xff]  ;;  %s389_s2 = smov [#allocation9]   ;;  %s242_s5 = sshll.u32 %s431_s3, 4  ;;  %s243_s5 = int_to_ptr.hbm [resolvable:$true] %s242_s5 }
  0x10   :  { %172 = vmatpush.msra.mxu2 %v125_v0  ;;  %v124_v2 = vld [vmem:[#allocation6 + $0x170] sm:$0xff]  ;;  %v123_v3 = vld [vmem:[#allocation6 + $0x168] sm:$0xff]  ;;  %v121_v5 = vld [vmem:[#allocation6 + $0x158] sm:$0xff]  ;;  %s240_s29 = sshll.u32 %s389_s2, 4  ;;  %s241_s29 = int_to_ptr.vmem [resolvable:$true] %s240_s29 }
  0x11   :  { %v119_v4 = vld [vmem:[#allocation6 + $0x148] sm:$0xff]  ;;  %149 = vmatpush.msra.mxu1 %v124_v2  ;;  %256 = vmatpush.msra.mxu3 %v123_v3  ;;  %v120_v6 = vld [vmem:[#allocation6 + $0x150] sm:$0xff]  ;;  %v118_v7 = vld [vmem:[#allocation6 + $0x140] sm:$0xff] }
  0x12   :  { %173 = vmatpush.msra.mxu2 %v122_v1  ;;  %v117_v8 = vld [vmem:[#allocation6 + $0x138] sm:$0xff]  ;;  %126 = vmatpush.msra.mxu0 %v123_v3  ;;  %v116_v9 = vld [vmem:[#allocation6 + $0x130] sm:$0xff]  ;;  %v115_v10 = vld [vmem:[#allocation6 + $0x128] sm:$0xff] }
  0x13   :  { %150 = vmatpush.msra.mxu1 %v121_v5  ;;  %257 = vmatpush.msra.mxu3 %v120_v6  ;;  %v114_v11 = vld [vmem:[#allocation6 + $0x120] sm:$0xff]  ;;  %v113_v12 = vld [vmem:[#allocation6 + $0x118] sm:$0xff]  ;;  %v112_v13 = vld [vmem:[#allocation6 + $0x110] sm:$0xff] }
  0x14   :  { %174 = vmatpush.msra.mxu2 %v119_v4  ;;  %127 = vmatpush.msra.mxu0 %v120_v6  ;;  %v111_v14 = vld [vmem:[#allocation6 + $0x108] sm:$0xff]  ;;  %v110_v15 = vld [vmem:[#allocation6 + $0x100] sm:$0xff]  ;;  %v109_v16 = vld [vmem:[#allocation6 + $0xf8] sm:$0xff] }
  0x15   :  { %151 = vmatpush.msra.mxu1 %v118_v7  ;;  %258 = vmatpush.msra.mxu3 %v117_v8  ;;  %v108_v17 = vld [vmem:[#allocation6 + $0xf0] sm:$0xff]  ;;  %v107_v18 = vld [vmem:[#allocation6 + $0xe8] sm:$0xff]  ;;  %v106_v19 = vld [vmem:[#allocation6 + $0xe0] sm:$0xff] }
  0x16   :  { %175 = vmatpush.msra.mxu2 %v116_v9  ;;  %128 = vmatpush.msra.mxu0 %v117_v8  ;;  %v105_v20 = vld [vmem:[#allocation6 + $0xd8] sm:$0xff]  ;;  %v104_v21 = vld [vmem:[#allocation6 + $0xd0] sm:$0xff]  ;;  %v103_v22 = vld [vmem:[#allocation6 + $0xc8] sm:$0xff] }
  0x17   :  { %152 = vmatpush.msra.mxu1 %v115_v10  ;;  %259 = vmatpush.msra.mxu3 %v114_v11  ;;  %v102_v23 = vld [vmem:[#allocation6 + $0xc0] sm:$0xff]  ;;  %v101_v24 = vld [vmem:[#allocation6 + $0xb8] sm:$0xff]  ;;  %v100_v25 = vld [vmem:[#allocation6 + $0xb0] sm:$0xff] }
  0x18   :  { %176 = vmatpush.msra.mxu2 %v113_v12  ;;  %129 = vmatpush.msra.mxu0 %v114_v11  ;;  %v99_v26 = vld [vmem:[#allocation6 + $0xa8] sm:$0xff]  ;;  %v98_v27 = vld [vmem:[#allocation6 + $0xa0] sm:$0xff]  ;;  %v97_v28 = vld [vmem:[#allocation6 + $0x98] sm:$0xff] }
  0x19   :  { %153 = vmatpush.msra.mxu1 %v112_v13  ;;  %260 = vmatpush.msra.mxu3 %v111_v14  ;;  %v96_v29 = vld [vmem:[#allocation6 + $0x90] sm:$0xff]  ;;  %v95_v30 = vld [vmem:[#allocation6 + $0x88] sm:$0xff]  ;;  %v94_v31 = vld [vmem:[#allocation6 + $0x80] sm:$0xff] }
  0x1a   :  { %177 = vmatpush.msra.mxu2 %v110_v15  ;;  %130 = vmatpush.msra.mxu0 %v111_v14  ;;  %v93_v32 = vld [vmem:[#allocation6 + $0x78] sm:$0xff]  ;;  %v92_v33 = vld [vmem:[#allocation6 + $0x70] sm:$0xff]  ;;  %v91_v34 = vld [vmem:[#allocation6 + $0x68] sm:$0xff] }
  0x1b   :  { %154 = vmatpush.msra.mxu1 %v109_v16  ;;  %261 = vmatpush.msra.mxu3 %v108_v17  ;;  %v90_v35 = vld [vmem:[#allocation6 + $0x60] sm:$0xff]  ;;  %v89_v36 = vld [vmem:[#allocation6 + $0x58] sm:$0xff]  ;;  %v88_v37 = vld [vmem:[#allocation6 + $0x50] sm:$0xff] }
  0x1c   :  { %178 = vmatpush.msra.mxu2 %v107_v18  ;;  %131 = vmatpush.msra.mxu0 %v108_v17  ;;  %v87_v38 = vld [vmem:[#allocation6 + $0x48] sm:$0xff]  ;;  %v86_v39 = vld [vmem:[#allocation6 + $0x40] sm:$0xff]  ;;  %v85_v40 = vld [vmem:[#allocation6 + $0x38] sm:$0xff] }
  0x1d   :  { %155 = vmatpush.msra.mxu1 %v106_v19  ;;  %262 = vmatpush.msra.mxu3 %v105_v20  ;;  %v84_v41 = vld [vmem:[#allocation6 + $0x30] sm:$0xff]  ;;  %v83_v42 = vld [vmem:[#allocation6 + $0x28] sm:$0xff]  ;;  %v82_v43 = vld [vmem:[#allocation6 + $0x20] sm:$0xff] }
  0x1e   :  { %179 = vmatpush.msra.mxu2 %v104_v21  ;;  %132 = vmatpush.msra.mxu0 %v105_v20  ;;  %v81_v44 = vld [vmem:[#allocation6 + $0x18] sm:$0xff]  ;;  %v80_v45 = vld [vmem:[#allocation6 + $0x10] sm:$0xff]  ;;  %v79_v47 = vld [vmem:[#allocation6 + $0x8] sm:$0xff] }
  0x1f   :  { %156 = vmatpush.msra.mxu1 %v103_v22  ;;  %263 = vmatpush.msra.mxu3 %v102_v23  ;;  %v76_v46 = vld [vmem:[#allocation3] sm:$0xff]  ;;  %v78_v48 = vld [vmem:[#allocation6] sm:$0xff]  ;;  %v77_v49 = vld [vmem:[#allocation3 + $0x8] sm:$0xff] }
  0x20   :  { %180 = vmatpush.msra.mxu2 %v101_v24  ;;  %133 = vmatpush.msra.mxu0 %v102_v23  ;;  %v216_v50 = vld [vmem:[#allocation8] sm:$0x7] }
  0x21   :  { %157 = vmatpush.msra.mxu1 %v100_v25  ;;  %264 = vmatpush.msra.mxu3 %v99_v26  ;;  %v219_v51 = vperm.slane %v216_v50, 1  ;;  %v218_v52 = vperm.slane %v216_v50, 0  ;;  %v220_v55 = vperm.slane %v216_v50, 2 }
  0x22   :  { %181 = vmatpush.msra.mxu2 %v98_v27  ;;  %134 = vmatpush.msra.mxu0 %v99_v26 }
  0x23   :  { %158 = vmatpush.msra.mxu1 %v97_v28  ;;  %265 = vmatpush.msra.mxu3 %v96_v29 }
  0x24   :  { %182 = vmatpush.msra.mxu2 %v95_v30  ;;  %135 = vmatpush.msra.mxu0 %v96_v29 }
  0x25   :  { %159 = vmatpush.msra.mxu1 %v94_v31  ;;  %266 = vmatpush.msra.mxu3 %v93_v32 }
  0x26   :  { %183 = vmatpush.msra.mxu2 %v92_v33  ;;  %136 = vmatpush.msra.mxu0 %v93_v32 }
  0x27   :  { %160 = vmatpush.msra.mxu1 %v91_v34  ;;  %267 = vmatpush.msra.mxu3 %v90_v35 }
  0x28   :  { %184 = vmatpush.msra.mxu2 %v89_v36  ;;  %137 = vmatpush.msra.mxu0 %v90_v35 }
  0x29   :  { %161 = vmatpush.msra.mxu1 %v88_v37  ;;  %268 = vmatpush.msra.mxu3 %v87_v38 }
  0x2a   :  { %185 = vmatpush.msra.mxu2 %v86_v39  ;;  %138 = vmatpush.msra.mxu0 %v87_v38 }
  0x2b   :  { %162 = vmatpush.msra.mxu1 %v85_v40  ;;  %269 = vmatpush.msra.mxu3 %v84_v41 }
  0x2c   :  { %186 = vmatpush.msra.mxu2 %v83_v42  ;;  %139 = vmatpush.msra.mxu0 %v84_v41 }
  0x2d   :  { %163 = vmatpush.msra.mxu1 %v82_v43  ;;  %270 = vmatpush.msra.mxu3 %v81_v44 }
  0x2e   :  { %187 = vmatpush.msra.mxu2 %v80_v45  ;;  %140 = vmatpush.msra.mxu0 %v81_v44 }
  0x2f   :  { %188 = vmatmul.f32.vlgmr.msra.gmra.mxu2 %v76_v46  ;;  %164 = vmatpush.msra.mxu1 %v79_v47 }
  0x30   :  { %165 = vmatmul.f32.vlgmr.msra.gmra.mxu1 %v76_v46  ;;  %271 = vmatpush.msra.mxu3 %v78_v48 }
  0x31   :  { %145 = vmatmul.f32.vlgmr.msra.gmra.mxu3 %v77_v49  ;;  %141 = vmatpush.msra.mxu0 %v78_v48 }
  0x32   :  { %142 = vmatmul.f32.vlgmr.msra.gmra.mxu0 %v76_v46 }
  0x37   :  { %191 = vmatmul.f32.gmra.mxu2 %v77_v49 }
  0x38   :  { %168 = vmatmul.f32.gmra.mxu1 %v77_v49 }
  0xad   :  { %v166_v53 = vpop.f32.mrf.mxu1 }
  0xae   :  { %v225_v54 = vadd.f32 %v219_v51, %v166_v53 }
  0xaf   :  { %v143_v56 = vpop.f32.mrf.mxu0 }
  0xb0   :  { %231 = vst [vmem:[#allocation9 + $0x8] sm:$0xff] %v225_v54  ;;  %v224_v57 = vadd.f32 %v218_v52, %v143_v56 }
  0xb2   :  { %v189_v58 = vpop.f32.mrf.mxu2  ;;  %230 = vst [vmem:[#allocation9] sm:$0xff] %v224_v57 }
  0xb3   :  { %v226_v59 = vadd.f32 %v220_v55, %v189_v58 }
  0xb4   :  { %v146_v60 = vpop.f32.mrf.mxu3 }
  0xb5   :  { %232 = vst [vmem:[#allocation9 + $0x10] sm:$0xff] %v226_v59  ;;  %v227_v61 = vadd.f32 %v218_v52, %v146_v60  ;;  %v169_v62 = vpop.f32.mrf.mxu1 }
  0xb6   :  { %v228_v63 = vadd.f32 %v219_v51, %v169_v62 }
  0xb7   :  { %233 = vst [vmem:[#allocation9 + $0x18] sm:$0xff] %v227_v61 }
  0xb8   :  { %234 = vst [vmem:[#allocation9 + $0x20] sm:$0xff] %v228_v63 }
  0xba   :  { %v192_v0 = vpop.f32.mrf.mxu2 }
  0xbb   :  { %v229_v1 = vadd.f32 %v220_v55, %v192_v0 }
  0xbd   :  { %235 = vst [vmem:[#allocation9 + $0x28] sm:$0xff] %v229_v1 }
  0xbe   :  { %248 = dma.vmem_to_hbm [thread:$0]  %s241_s29, 768, %s243_s5, [#allocation5], %s383_s20, %s383_s20, %s384_s21  }
  0xbf   :  { %380 = dma.done.wait [#allocation5], 768  }
  0xc0   :  { %381 = vsyncadd [#allocation5], 4294966528 }
  0xc1   :  { %253 = vsyncpa [#allocation4], 1 }
  0xc2   :  { %254 = vsyncpa [#allocation7], 1 }
  0xc3   :  { %255 = vsyncpa [#allocation5], 1 }

</bundles_post_ra>
